<compile_context>
chip_gen: v6e
topology: v6e:2x2x1
jax: 0.10.0
libtpu: 0.0.40
codegen_flags: <defaults>
</compile_context>

<pallas_src>
import jax
import jax.numpy as jnp
from jax.experimental import pallas as pl
from jax.experimental.pallas import tpu as pltpu


def _conv1x1_kernel(w_ref, x_ref, b_ref, o_ref):
    # w_ref: (Cout, Cin)  x_ref: (Cin, Tm)  b_ref: (Cout, 1)  o_ref: (Cout, Tm)
    acc = jnp.dot(w_ref[...], x_ref[...], preferred_element_type=jnp.float32)
    o_ref[...] = (acc + b_ref[...]).astype(o_ref.dtype)
    # TODO(synk): if a downstream activation / residual add follows this conv
    # in the full model, fuse it here at the o_ref write (op is DMA/launch
    # bound, not MXU bound).


def conv2d_1x1(x_nchw, weight, bias, *, tile_m=1536):
    """1x1 conv, stride 1, no padding.

    x_nchw: (N, Cin, H, W) float32
    weight: (Cout, Cin, 1, 1) float32 (PyTorch layout)
    bias:   (Cout,) float32
    returns (N, Cout, H, W) float32
    """
    N, Cin, H, W = x_nchw.shape
    Cout = weight.shape[0]
    M = N * H * W

    # N == 1 (the module's case): pure reshape, zero layout copies.
    if N == 1:
        x_cm = x_nchw.reshape(Cin, M)                      # (Cin, M)
    else:
        x_cm = jnp.transpose(x_nchw, (1, 0, 2, 3)).reshape(Cin, M)

    # Pad M up to a multiple of tile_m so every block (and every output
    # store) is full-width / lane-dense.  Cheap: < 40 KB of extra traffic.
    num_blocks = pl.cdiv(M, tile_m)
    Mp = num_blocks * tile_m
    if Mp != M:
        x_cm = jnp.pad(x_cm, ((0, 0), (0, Mp - M)))

    w_mat = weight.reshape(Cout, Cin)                      # (Cout, Cin)
    b_col = bias.reshape(Cout, 1)                          # (Cout, 1)

    # ~6 MFLOP over ~1 MB of traffic: advise XLA of the real (tiny) cost.
    cost = pl.CostEstimate(
        flops=2 * Mp * Cin * Cout,
        transcendentals=0,
        bytes_accessed=4 * (Mp * Cin + Mp * Cout + Cin * Cout + Cout),
    )

    out_cm = pl.pallas_call(
        _conv1x1_kernel,
        out_shape=jax.ShapeDtypeStruct((Cout, Mp), x_nchw.dtype),
        grid=(num_blocks,),
        in_specs=[
            pl.BlockSpec((Cout, Cin), lambda i: (0, 0)),     # weights (resident)
            pl.BlockSpec((Cin, tile_m), lambda i: (0, i)),   # activation tile
            pl.BlockSpec((Cout, 1), lambda i: (0, 0)),       # bias (resident)
        ],
        out_specs=pl.BlockSpec((Cout, tile_m), lambda i: (0, i)),
        compiler_params=pltpu.CompilerParams(
            dimension_semantics=("parallel",)),              # 2 TCs on v7x
        cost_estimate=cost,
    )(w_mat, x_cm, b_col)

    out_cm = out_cm[:, :M]                                   # drop pad columns

    # (Cout, N*H*W) -> NCHW.  For N=1 this is again a pure reshape.
    if N == 1:
        return out_cm.reshape(1, Cout, H, W)
    out = out_cm.reshape(Cout, N, H, W)
    return jnp.transpose(out, (1, 0, 2, 3))


if __name__ == "__main__":
    key = jax.random.PRNGKey(0)
    kx, kw, kb = jax.random.split(key, 3)

    # Shapes implied by the module: input (1, 16, 54, 54), Conv2d(16, 64, 1x1)
    N, Cin, H, W = 1, 16, 54, 54
    Cout = 64

    x = jax.random.normal(kx, (N, Cin, H, W), dtype=jnp.float32)
    weight = jax.random.normal(kw, (Cout, Cin, 1, 1), dtype=jnp.float32) * 0.1
    bias = jax.random.normal(kb, (Cout,), dtype=jnp.float32) * 0.1

    out = conv2d_1x1(x, weight, bias)
    out = jax.block_until_ready(out)

    # Reference check against plain JAX (same math as nn.Conv2d 1x1).
    ref = jnp.einsum("nchw,oc->nohw", x, weight.reshape(Cout, Cin)) \
        + bias.reshape(1, Cout, 1, 1)
    assert out.shape == (N, Cout, H, W)
    assert jnp.allclose(out, ref, atol=1e-4, rtol=1e-4)

    print("KERNEL_OK")
</pallas_src>

<mosaic_0001>
module attributes {stable_mosaic.version = 11 : i64} {
  func.func @_conv1x1_kernel(%arg0: i32, %arg1: memref<64x16xf32, #tpu.memory_space<vmem>>, %arg2: memref<16x1536xf32, #tpu.memory_space<vmem>>, %arg3: memref<64x1xf32, #tpu.memory_space<vmem>>, %arg4: memref<64x1536xf32, #tpu.memory_space<vmem>>) attributes {dimension_semantics = [#tpu.dimension_semantics<parallel>], iteration_bounds = array<i64: 2>, scalar_prefetch = 0 : i64, scratch_operands = 0 : i64, tpu.core_type = #tpu.core_type<tc>, window_params = [{pipeline_mode = #tpu.pipeline_mode<synchronous>, transform_indices = @transform_0, window_bounds = array<i64: 64, 16>}, {transform_indices = @transform_1, window_bounds = array<i64: 16, 1536>}, {pipeline_mode = #tpu.pipeline_mode<synchronous>, transform_indices = @transform_2, window_bounds = array<i64: 64, 1>}, {transform_indices = @transform_3, window_bounds = array<i64: 64, 1536>}]} {
    %c0 = arith.constant 0 : index
    %c0_0 = arith.constant 0 : index
    %0 = vector.load %arg1[%c0, %c0_0] : memref<64x16xf32, #tpu.memory_space<vmem>>, vector<64x16xf32>
    %c0_1 = arith.constant 0 : index
    %c0_2 = arith.constant 0 : index
    %1 = vector.load %arg2[%c0_1, %c0_2] : memref<16x1536xf32, #tpu.memory_space<vmem>>, vector<16x1536xf32>
    %cst = arith.constant dense<0.000000e+00> : vector<64x1536xf32>
    %2 = tpu.matmul %0, %1, %cst {dimension_numbers = #tpu.dot_dimension_numbers<[1], [0], [0], [1], [0, 0, 1, 1], [], []>} : vector<64x16xf32>, vector<16x1536xf32>, vector<64x1536xf32> -> vector<64x1536xf32>
    %c0_3 = arith.constant 0 : index
    %c0_4 = arith.constant 0 : index
    %3 = vector.load %arg3[%c0_3, %c0_4] : memref<64x1xf32, #tpu.memory_space<vmem>>, vector<64x1xf32>
    %4 = vector.broadcast %3 : vector<64x1xf32> to vector<64x1536xf32>
    %5 = arith.addf %2, %4 : vector<64x1536xf32>
    %c0_5 = arith.constant 0 : index
    %c0_6 = arith.constant 0 : index
    %6 = vector.load %arg4[%c0_5, %c0_6] : memref<64x1536xf32, #tpu.memory_space<vmem>>, vector<64x1536xf32>
    tpu.vector_store %arg4[%c0_5, %c0_6], %5 {strides = array<i32>} : memref<64x1536xf32, #tpu.memory_space<vmem>>, vector<64x1536xf32>,
    return
  }
  func.func @transform_0(%arg0: i32) -> (i32, i32) {
    %c0_i32 = arith.constant 0 : i32
    %c0_i32_0 = arith.constant 0 : i32
    %c0_i32_1 = arith.constant 0 : i32
    return %c0_i32, %c0_i32_0 : i32, i32
  }
  func.func @transform_1(%arg0: i32) -> (i32, i32) {
    %c0_i32 = arith.constant 0 : i32
    %c0_i32_0 = arith.constant 0 : i32
    return %c0_i32, %arg0 : i32, i32
  }
  func.func @transform_2(%arg0: i32) -> (i32, i32) {
    %c0_i32 = arith.constant 0 : i32
    %c0_i32_0 = arith.constant 0 : i32
    %c0_i32_1 = arith.constant 0 : i32
    return %c0_i32, %c0_i32_0 : i32, i32
  }
  func.func @transform_3(%arg0: i32) -> (i32, i32) {
    %c0_i32 = arith.constant 0 : i32
    %c0_i32_0 = arith.constant 0 : i32
    return %c0_i32, %arg0 : i32, i32
  }
}

</mosaic_0001>

<bundles_post_ra>
// kernel: tpu_custom_call.1
= control target key start
LH: loop header
LB: loop body
LE: loop exit
PB: predicated region body
PF: predicated region fallthrough
CT: control target
= control target key end

     0   :  { %8 = vsyncpa [#allocation3], 0  ;;  %s1994_s0 = inlined_call_operand.vmem [shape: f32[64,16], index: 0, kind: input, shape index: {}]   ;;  %s1995_s1 = inlined_call_operand.hbm [shape: f32[16,3072], index: 1, kind: input, shape index: {}]   ;;  %s1996_s2 = inlined_call_operand.vmem [shape: f32[64,1], index: 2, kind: input, shape index: {}]   ;;  %s1997_s3 = inlined_call_operand.hbm [shape: f32[64,3072], index: 3, kind: output, shape index: {}]  }
   0x1   :  { %10 = vsyncpa [#allocation3 + $0x1], 0 }
   0x2   :  { %11 = vsyncpa [#allocation4], 0 }
   0x3   :  { %13 = vsyncpa [#allocation4 + $0x1], 0  ;;  %s1398_s12 = smov 0   ;;  %s1400_s13 = smov 0  }
   0x4   :  { %s1402_s14 = smov 0   ;;  %s1404_s15 = smov 0  }
   0x5 LB: > { %s1419_s16 = sadd.s32 4294967295, %s1366_s15   ;;  %s1157_s17 = sadd.s32 4294967294, %s1366_s15   ;;  %s1366_s15 = sphi %s1404_s15, %s2012_s15   ;;  %s1362_s14 = sphi %s1402_s14, %s2011_s14   ;;  %s1358_s13 = sphi %s1400_s13, %s2010_s13   ;;  %s1354_s12 = sphi %s1398_s12, %s2009_s12  }
   0x6   : > { %s1423_s18 = sadd.s32 1, %s1366_s15   ;;  %s47_s19 = sadd.s32 1, %s1362_s14 }
   0x7   : > { %s44_s20 = ssub.s32 %s1366_s15, %s1423_s18  ;;  %p54_p0 = scmp.ne.s32.totalorder %s1362_s14, %s1358_s13 }
   0x8   : > { %p45_p1 = scmp.eq.s32.totalorder %s44_s20, 0  ;;  %p55_p2 = scmp.eq.s32.totalorder %s1366_s15, 0 }
   0x9   : > { %p60_p3 = scmp.ne.s32.totalorder %s1358_s13, %s1354_s12  ;;  %p61_p4 = scmp.eq.s32.totalorder %s1419_s16, 0 }
   0xa   : > { %s1435_s21 = scalar_select %p45_p1, %s1362_s14, %s47_s19  }
   0xb   : > { %p56_p5 = por %p55_p2, %p54_p0  ;;  %p1437_p6 = por %p61_p4, %p60_p3 }
   0xc   : > { %p105_p7 = scmp.eq.s32.totalorder %s1419_s16, 1  ;;  %p111_p8 = scmp.eq.s32.totalorder %s1157_s17, 1 }
   0xd   : > { %s2000_s22 = scalar_select %p1437_p6, 1, 0 }
   0xe   : > { %p1230_p10 = scmp.lt.s32.totalorder %s1366_s15, 2  ;;  %p1444_p11 = por %p105_p7, %p54_p0 }
   0xf   : > { %p1448_p12 = por %p111_p8, %p60_p3  ;;  %s137_s25 = sand.u32 1, %s1362_s14  }
  0x10   : > { %s2001_s23 = scalar_select %p1444_p11, 1, 0 }
  0x11   : > { %s2002_s24 = scalar_select %p1448_p12, 1, 0 }
  0x12   : > { %s1213_s26 = smul.u32 1536, %s1366_s15  ;;  %p1459_p13 = pnand %p1230_p10, %p56_p5 }
  0x13   : > { %s1215_s27 = smul.u32 192, %s137_s25  ;;  %s1466_s7 = scalar_lea.sflag [#allocation3], %s137_s25 }
  0x14   : > { %s1457_s30 = scalar_lea.hbm %s1995_s1, %s1213_s26  ;;  %p1276_p2 = pneg %p1459_p13 }
  0x15   : > { %s141_s5 = scalar_lea.vmem [#allocation2], %s1215_s27  ;;  %s1274_s8 = scalar_lea.hbm %s1457_s30, 3072 }
  0x16   : > { %s148_s6 = sshll.u32 %s141_s5, 4  ;;  %p1275_p1 = scmp.ne.s32.totalorder %s1457_s30, %s1274_s8  ;;  %s1463_s6 = int_to_ptr.vmem [resolvable:$true] %s148_s6 }
  0x17   : > { %s1279_s11 = scalar_lea.hbm %s1995_s1, 6144  ;;  %p1280_p5 = scmp.lt.s32.totalorder %s1457_s30, %s1995_s1 }
  0x18   : > { %p1277_p3 = pnand %p1276_p2, %p1275_p1  ;;  %p1281_p7 = scmp.lt.s32.totalorder %s1279_s11, %s1274_s8 }
  0x1a   : > { %p1278_p4 = pneg %p1277_p3  ;;  %p1282_p8 = por %p1281_p7, %p1280_p5 }
  0x1c   : > { %p1283_p10 = pnand %p1282_p8, %p1278_p4 }
  0x1e   : > { %1286 = shalt.err (!%p1283_p10)
}
  0x1f   : > { %s1287_s20 = scalar_lea.vmem %s1463_s6, 3072  ;;  %s1368_s25 = smov [#allocation2]  }
  0x20   : > { %p1288_p9 = scmp.ne.s32.totalorder %s1463_s6, %s1287_s20  ;;  %s1292_s26 = sshll.u32 %s1368_s25, 4  ;;  %s1293_s26 = int_to_ptr.vmem [resolvable:$false] %s1292_s26 }
  0x21   : > { %s1294_s27 = scalar_lea.vmem %s1293_s26, 6144  ;;  %p1295_p3 = scmp.lt.s32.totalorder %s1463_s6, %s1293_s26 }
  0x22   : > { %p1290_p0 = pnand %p1288_p9, %p1276_p2  ;;  %p1296_p12 = scmp.lt.s32.totalorder %s1294_s27, %s1287_s20 }
  0x24   : > { %p1291_p1 = pneg %p1290_p0  ;;  %p1297_p11 = por %p1296_p12, %p1295_p3 }
  0x26   : > { %p1298_p6 = pnand %p1297_p11, %p1291_p1 }
  0x28   : > { %1301 = shalt.err (!%p1298_p6)
}
  0x29   : > { %s1369_s28 = smov 3072   ;;  %s1370_s29 = smov 1536  }
  0x2a   : > { %s1371_s5 = smov 96   ;;  %p156_p9 = scmp.lt.s32.totalorder %s1366_s15, 3 }
  0x2b   : > { %1225 = dma.hbm_to_vmem [thread:$0]  (!%p1459_p13), %s1457_s30, 3072, %s1463_s6, %s1466_s7, %s1369_s28, %s1370_s29, %s1371_s5  }
  0x2c   : > { %p2004_p0 = scmp.ge.s32.totalorder %s1366_s15, 1 }
  0x2e   : > { %p157_p2 = pnand %p2004_p0, %p156_p9 }
  0x2f   : > { %s1491_s8 = sand.u32 (!%p157_p2), 1, %s1358_s13   ;;  %p2005_p6 = scmp.ne.s32.totalorder (!%p157_p2), %s2000_s22, 0 }
  0x30   : > { %160 = sbr.rel (%p157_p2) target bundleno = 365 (0x16d), region = 32  ;;  %s163_s10 = scalar_lea.sflag (!%p157_p2), [#allocation3], %s1491_s8 }
  0x31   : > { %s1216_s9 = smul.u32 (!%p157_p2), 192, %s1491_s8 }
  0x33   : > { %s1495_s11 = scalar_lea.vmem (!%p157_p2), [#allocation2], %s1216_s9 }
  0x35   : > { %1345 = dma.done.wait (%p2005_p6), %s163_s10, 3072  }
  0x36   : > { %1347 = vsyncadd (%p2005_p6), %s163_s10, 4294964224  ;;  %v1372_v0 = vmov 0.0   ;;  %v1373_v1 = vmov 0   ;;  %v212_v2 = vld [vmem:[%s1495_s11 + $0x68] sm:$0xff]  ;;  %v214_v3 = vld [vmem:[%s1495_s11 + $0x78] sm:$0xff]  ;;  %vm271_vm0 = vcmask 130048  }
  0x37   : > { %360 = vmatprep.mubr.f32.mxu0 %v1372_v0  ;;  %473 = vmatprep.mubr.f32.mxu1 %v1372_v0  ;;  %v211_v4 = vld [vmem:[%s1495_s11 + $0x60] sm:$0xff]  ;;  %v213_v5 = vld [vmem:[%s1495_s11 + $0x70] sm:$0xff]  ;;  %v200_v6 = vld [vmem:[%s1495_s11 + $0x8] sm:$0xff]  ;;  %s1214_s30 = smul.u32 1536, %s1419_s16  ;;  %s1071_s17 = scalar_lea.sflag [#allocation4], %s1491_s8 }
  0x38   : > { %1272 = vset.pattern.permute.xlu0 %v1373_v1  ;;  %1273 = vset.pattern.permute.xlu1 %v1373_v1  ;;  %v202_v7 = vld [vmem:[%s1495_s11 + $0x18] sm:$0xff]  ;;  %v199_v8 = vld [vmem:[%s1495_s11] sm:$0xff]  ;;  %v201_v9 = vld [vmem:[%s1495_s11 + $0x10] sm:$0xff]  ;;  %p2006_p12 = scmp.ne.s32.totalorder %s2001_s23, 0  ;;  %s1374_s20 = smov [#allocation5]  }
  0x39   : > { %324 = vmatprep.subr.mxu0 %v212_v2  ;;  %437 = vmatprep.subr.mxu1 %v214_v3  ;;  %v1514_v10 = vld [vmem:[%s1994_s0] sm:$0xff]  ;;  %v216_v11 = vld [vmem:[%s1495_s11 + $0x88] sm:$0xff]  ;;  %v218_v12 = vld [vmem:[%s1495_s11 + $0x98] sm:$0xff]  ;;  %s1943_s7 = scalar_lea.hbm %s1997_s3, %s1214_s30  ;;  %s1306_s25 = sshll.u32 %s1374_s20, 4  ;;  %s1307_s25 = int_to_ptr.vmem [resolvable:$false] %s1306_s25 }
  0x3a   : > { %325 = vmatpush1.msra.mxu0 %v211_v4  ;;  %438 = vmatpush1.msra.mxu1 %v213_v5  ;;  %v215_v13 = vld [vmem:[%s1495_s11 + $0x80] sm:$0xff]  ;;  %v217_v14 = vld [vmem:[%s1495_s11 + $0x90] sm:$0xff]  ;;  %v1527_v15 = vld [vmem:[%s1994_s0 + $0x8] sm:$0xff]  ;;  %s1308_s26 = scalar_lea.vmem %s1307_s25, 24576 }
  0x3b   : > { %326 = vmatprep.subr.mxu0 %v200_v6  ;;  %439 = vmatprep.subr.mxu1 %v202_v7  ;;  %v204_v16 = vld [vmem:[%s1495_s11 + $0x28] sm:$0xff]  ;;  %v206_v17 = vld [vmem:[%s1495_s11 + $0x38] sm:$0xff]  ;;  %v203_v18 = vld [vmem:[%s1495_s11 + $0x20] sm:$0xff] }
  0x3c   : > { %327 = vmatpush1.msra.mxu0 %v199_v8  ;;  %440 = vmatpush1.msra.mxu1 %v201_v9  ;;  %v205_v19 = vld [vmem:[%s1495_s11 + $0x30] sm:$0xff]  ;;  %v220_v21 = vld [vmem:[%s1495_s11 + $0xa8] sm:$0xff]  ;;  %v222_v22 = vld [vmem:[%s1495_s11 + $0xb8] sm:$0xff] }
  0x3d   : > { %1162 = vmatmul.mubr.msk.f32.vlgmr.msra.gmra.mxu0 %vm271_vm0, %v1514_v10  ;;  %1170 = vmatmul.mubr.msk.f32.vlgmr.msra.gmra.mxu1 %vm271_vm0, %v1514_v10  ;;  %v1544_v20 = vld [vmem:[%s1994_s0 + $0x10] sm:$0xff]  ;;  %v223_v23 = vld [vmem:[%s1996_s2] sm:$0xff]  ;;  %v1563_v25 = vld [vmem:[%s1994_s0 + $0x18] sm:$0xff] }
  0x3e   : > { %550 = vmatprep.subr.mxu0 %v216_v11  ;;  %663 = vmatprep.subr.mxu1 %v218_v12  ;;  %v225_v24 = vld [vmem:[%s1996_s2 + $0x10] sm:$0xff]  ;;  %v224_v26 = vld [vmem:[%s1996_s2 + $0x8] sm:$0xff]  ;;  %v226_v27 = vld [vmem:[%s1996_s2 + $0x18] sm:$0xff] }
  0x3f   : > { %551 = vmatpush1.msra.mxu0 %v215_v13  ;;  %664 = vmatpush1.msra.mxu1 %v217_v14  ;;  %v1580_v28 = vld [vmem:[%s1994_s0 + $0x20] sm:$0xff]  ;;  %v228_v30 = vld [vmem:[%s1996_s2 + $0x28] sm:$0xff]  ;;  %v229_v32 = vld [vmem:[%s1996_s2 + $0x30] sm:$0xff] }
  0x40   : > { %366 = vmatprep.mubr.f32.mxu0 %v1372_v0  ;;  %479 = vmatprep.mubr.f32.mxu1 %v1372_v0  ;;  %v227_v29 = vld [vmem:[%s1996_s2 + $0x20] sm:$0xff]  ;;  %v1597_v31 = vld [vmem:[%s1994_s0 + $0x28] sm:$0xff]  ;;  %v230_v33 = vld [vmem:[%s1996_s2 + $0x38] sm:$0xff] }
  0x41   : > { %1163 = vmatmul.mubr.msk.f32.gmra.mxu0 %vm271_vm0, %v1527_v15  ;;  %1171 = vmatmul.mubr.msk.f32.gmra.mxu1 %vm271_vm0, %v1527_v15  ;;  %v1614_v34 = vld [vmem:[%s1994_s0 + $0x30] sm:$0xff]  ;;  %v1625_v35 = vld [vmem:[%s1994_s0 + $0x38] sm:$0xff]  ;;  %v219_v36 = vld [vmem:[%s1495_s11 + $0xa0] sm:$0xff] }
  0x42   : > { %372 = vmatprep.mubr.f32.mxu0 %v1372_v0  ;;  %485 = vmatprep.mubr.f32.mxu1 %v1372_v0  ;;  %v221_v37 = vld [vmem:[%s1495_s11 + $0xb0] sm:$0xff]  ;;  %v208_v38 = vld [vmem:[%s1495_s11 + $0x48] sm:$0xff]  ;;  %v210_v39 = vld [vmem:[%s1495_s11 + $0x58] sm:$0xff] }
  0x43   : > { %552 = vmatprep.subr.mxu0 %v204_v16  ;;  %665 = vmatprep.subr.mxu1 %v206_v17  ;;  %v207_v40 = vld [vmem:[%s1495_s11 + $0x40] sm:$0xff]  ;;  %v209_v41 = vld [vmem:[%s1495_s11 + $0x50] sm:$0xff]  ;;  %s1217_s11 = smul.u32 768, %s1491_s8 }
  0x44   : > { %553 = vmatpush1.msra.mxu0 %v203_v18  ;;  %666 = vmatpush1.msra.mxu1 %v205_v19 }
  0x45   : > { %1164 = vmatmul.mubr.msk.f32.gmra.mxu0 %vm271_vm0, %v1544_v20  ;;  %1172 = vmatmul.mubr.msk.f32.gmra.mxu1 %vm271_vm0, %v1544_v20  ;;  %s1740_s22 = scalar_lea.vmem [#allocation5], %s1217_s11 }
  0x46   : > { %378 = vmatprep.mubr.f32.mxu0 %v1372_v0  ;;  %491 = vmatprep.mubr.f32.mxu1 %v1372_v0  ;;  %s1084_s4 = sshll.u32 %s1740_s22, 4  ;;  %s1945_s4 = int_to_ptr.vmem [resolvable:$true] %s1084_s4 }
  0x47   : > { %776 = vmatprep.subr.mxu0 %v220_v21  ;;  %889 = vmatprep.subr.mxu1 %v222_v22  ;;  %s1302_s19 = scalar_lea.vmem %s1945_s4, 12288  ;;  %p1309_p5 = scmp.lt.s32.totalorder %s1945_s4, %s1307_s25 }
  0x48   : > { %233 = vperm.xlu0 %1272, %v223_v23   ;;  %243 = vperm.xlu1 %1273, %v225_v24   ;;  %p1303_p11 = scmp.ne.s32.totalorder %s1945_s4, %s1302_s19  ;;  %p1310_p7 = scmp.lt.s32.totalorder %s1308_s26, %s1302_s19 }
  0x49   : > { %1165 = vmatmul.mubr.msk.f32.gmra.mxu0 %vm271_vm0, %v1563_v25  ;;  %1173 = vmatmul.mubr.msk.f32.gmra.mxu1 %vm271_vm0, %v1563_v25 }
  0x4a   : > { %384 = vmatprep.mubr.f32.mxu0 %v1372_v0  ;;  %497 = vmatprep.mubr.f32.mxu1 %v1372_v0  ;;  %p1304_p13 = pnand %p1303_p11, %p2006_p12  ;;  %p1311_p8 = por %p1310_p7, %p1309_p5 }
  0x4c   : > { %238 = vperm.xlu0 %1272, %v224_v26   ;;  %248 = vperm.xlu1 %1273, %v226_v27   ;;  %p1305_p4 = pneg %p1304_p13 }
  0x4d   : > { %1166 = vmatmul.mubr.msk.f32.gmra.mxu0 %vm271_vm0, %v1580_v28  ;;  %1174 = vmatmul.mubr.msk.f32.gmra.mxu1 %vm271_vm0, %v1580_v28 }
  0x4e   : > { %390 = vmatprep.mubr.f32.mxu0 %v1372_v0  ;;  %503 = vmatprep.mubr.f32.mxu1 %v1372_v0  ;;  %p1312_p10 = pnand %p1311_p8, %p1305_p4 }
  0x50   : > { %253 = vperm.xlu0 %1272, %v227_v29   ;;  %258 = vperm.xlu1 %1273, %v228_v30  }
  0x51   : > { %1167 = vmatmul.mubr.msk.f32.gmra.mxu0 %vm271_vm0, %v1597_v31  ;;  %1175 = vmatmul.mubr.msk.f32.gmra.mxu1 %vm271_vm0, %v1597_v31 }
  0x52   : > { %396 = vmatprep.mubr.f32.mxu0 %v1372_v0  ;;  %509 = vmatprep.mubr.f32.mxu1 %v1372_v0 }
  0x54   : > { %263 = vperm.xlu0 %1272, %v229_v32   ;;  %268 = vperm.xlu1 %1273, %v230_v33  }
  0x55   : > { %1168 = vmatmul.mubr.msk.f32.gmra.mxu0 %vm271_vm0, %v1614_v34  ;;  %1176 = vmatmul.mubr.msk.f32.gmra.mxu1 %vm271_vm0, %v1614_v34 }
  0x56   : > { %402 = vmatprep.mubr.f32.mxu0 %v1372_v0  ;;  %515 = vmatprep.mubr.f32.mxu1 %v1372_v0 }
  0x59   : > { %1169 = vmatmul.mubr.msk.f32.gmra.mxu0 %vm271_vm0, %v1625_v35  ;;  %1177 = vmatmul.mubr.msk.f32.gmra.mxu1 %vm271_vm0, %v1625_v35 }
  0x5a   : > { %586 = vmatprep.mubr.f32.mxu0 %v1372_v0  ;;  %699 = vmatprep.mubr.f32.mxu1 %v1372_v0 }
  0x5d   : > { %1178 = vmatmul.mubr.msk.f32.vlgmr.msra.gmra.mxu0 %vm271_vm0, %v1514_v10  ;;  %1186 = vmatmul.mubr.msk.f32.vlgmr.msra.gmra.mxu1 %vm271_vm0, %v1514_v10 }
  0x5e   : > { %777 = vmatpush1.msra.mxu0 %v219_v36  ;;  %890 = vmatpush1.msra.mxu1 %v221_v37 }
  0x5f   : > { %592 = vmatprep.mubr.f32.mxu0 %v1372_v0  ;;  %705 = vmatprep.mubr.f32.mxu1 %v1372_v0 }
  0x60   : > { %778 = vmatprep.subr.mxu0 %v208_v38  ;;  %891 = vmatprep.subr.mxu1 %v210_v39 }
  0x61   : > { %1179 = vmatmul.mubr.msk.f32.gmra.mxu0 %vm271_vm0, %v1527_v15  ;;  %1187 = vmatmul.mubr.msk.f32.gmra.mxu1 %vm271_vm0, %v1527_v15 }
  0x62   : > { %598 = vmatprep.mubr.f32.mxu0 %v1372_v0  ;;  %711 = vmatprep.mubr.f32.mxu1 %v1372_v0 }
  0x63   : > { %779 = vmatpush1.msra.mxu0 %v207_v40  ;;  %892 = vmatpush1.msra.mxu1 %v209_v41 }
  0x65   : > { %1180 = vmatmul.mubr.msk.f32.gmra.mxu0 %vm271_vm0, %v1544_v20  ;;  %1188 = vmatmul.mubr.msk.f32.gmra.mxu1 %vm271_vm0, %v1544_v20 }
  0x66   : > { %604 = vmatprep.mubr.f32.mxu0 %v1372_v0  ;;  %717 = vmatprep.mubr.f32.mxu1 %v1372_v0 }
  0x69   : > { %1181 = vmatmul.mubr.msk.f32.gmra.mxu0 %vm271_vm0, %v1563_v25  ;;  %1189 = vmatmul.mubr.msk.f32.gmra.mxu1 %vm271_vm0, %v1563_v25 }
  0x6a   : > { %610 = vmatprep.mubr.f32.mxu0 %v1372_v0  ;;  %723 = vmatprep.mubr.f32.mxu1 %v1372_v0 }
  0x6d   : > { %1182 = vmatmul.mubr.msk.f32.gmra.mxu0 %vm271_vm0, %v1580_v28  ;;  %1190 = vmatmul.mubr.msk.f32.gmra.mxu1 %vm271_vm0, %v1580_v28 }
  0x6e   : > { %616 = vmatprep.mubr.f32.mxu0 %v1372_v0  ;;  %729 = vmatprep.mubr.f32.mxu1 %v1372_v0 }
  0x71   : > { %1183 = vmatmul.mubr.msk.f32.gmra.mxu0 %vm271_vm0, %v1597_v31  ;;  %1191 = vmatmul.mubr.msk.f32.gmra.mxu1 %vm271_vm0, %v1597_v31 }
  0x72   : > { %622 = vmatprep.mubr.f32.mxu0 %v1372_v0  ;;  %735 = vmatprep.mubr.f32.mxu1 %v1372_v0 }
  0x75   : > { %1184 = vmatmul.mubr.msk.f32.gmra.mxu0 %vm271_vm0, %v1614_v34  ;;  %1192 = vmatmul.mubr.msk.f32.gmra.mxu1 %vm271_vm0, %v1614_v34 }
  0x76   : > { %628 = vmatprep.mubr.f32.mxu0 %v1372_v0  ;;  %741 = vmatprep.mubr.f32.mxu1 %v1372_v0 }
  0x79   : > { %1185 = vmatmul.mubr.msk.f32.gmra.mxu0 %vm271_vm0, %v1625_v35  ;;  %1193 = vmatmul.mubr.msk.f32.gmra.mxu1 %vm271_vm0, %v1625_v35 }
  0x7a   : > { %812 = vmatprep.mubr.f32.mxu0 %v1372_v0  ;;  %925 = vmatprep.mubr.f32.mxu1 %v1372_v0 }
  0x7d   : > { %1194 = vmatmul.mubr.msk.f32.vlgmr.msra.gmra.mxu0 %vm271_vm0, %v1514_v10  ;;  %1202 = vmatmul.mubr.msk.f32.vlgmr.msra.gmra.mxu1 %vm271_vm0, %v1514_v10 }
  0x7e   : > { %818 = vmatprep.mubr.f32.mxu0 %v1372_v0  ;;  %931 = vmatprep.mubr.f32.mxu1 %v1372_v0 }
  0x81   : > { %1195 = vmatmul.mubr.msk.f32.gmra.mxu0 %vm271_vm0, %v1527_v15  ;;  %1203 = vmatmul.mubr.msk.f32.gmra.mxu1 %vm271_vm0, %v1527_v15 }
  0x82   : > { %824 = vmatprep.mubr.f32.mxu0 %v1372_v0  ;;  %937 = vmatprep.mubr.f32.mxu1 %v1372_v0 }
  0x85   : > { %1196 = vmatmul.mubr.msk.f32.gmra.mxu0 %vm271_vm0, %v1544_v20  ;;  %1204 = vmatmul.mubr.msk.f32.gmra.mxu1 %vm271_vm0, %v1544_v20 }
  0x86   : > { %830 = vmatprep.mubr.f32.mxu0 %v1372_v0  ;;  %943 = vmatprep.mubr.f32.mxu1 %v1372_v0 }
  0x89   : > { %1197 = vmatmul.mubr.msk.f32.gmra.mxu0 %vm271_vm0, %v1563_v25  ;;  %1205 = vmatmul.mubr.msk.f32.gmra.mxu1 %vm271_vm0, %v1563_v25 }
  0x8a   : > { %836 = vmatprep.mubr.f32.mxu0 %v1372_v0  ;;  %949 = vmatprep.mubr.f32.mxu1 %v1372_v0 }
  0x8d   : > { %1198 = vmatmul.mubr.msk.f32.gmra.mxu0 %vm271_vm0, %v1580_v28  ;;  %1206 = vmatmul.mubr.msk.f32.gmra.mxu1 %vm271_vm0, %v1580_v28 }
  0x8e   : > { %842 = vmatprep.mubr.f32.mxu0 %v1372_v0  ;;  %955 = vmatprep.mubr.f32.mxu1 %v1372_v0 }
  0x91   : > { %1199 = vmatmul.mubr.msk.f32.gmra.mxu0 %vm271_vm0, %v1597_v31  ;;  %1207 = vmatmul.mubr.msk.f32.gmra.mxu1 %vm271_vm0, %v1597_v31 }
  0x92   : > { %848 = vmatprep.mubr.f32.mxu0 %v1372_v0  ;;  %961 = vmatprep.mubr.f32.mxu1 %v1372_v0 }
  0x95   : > { %1200 = vmatmul.mubr.msk.f32.gmra.mxu0 %vm271_vm0, %v1614_v34  ;;  %1208 = vmatmul.mubr.msk.f32.gmra.mxu1 %vm271_vm0, %v1614_v34 }
  0x96   : > { %854 = vmatprep.mubr.f32.mxu0 %v1372_v0  ;;  %967 = vmatprep.mubr.f32.mxu1 %v1372_v0 }
  0x99   : > { %1201 = vmatmul.mubr.msk.f32.gmra.mxu0 %vm271_vm0, %v1625_v35  ;;  %1209 = vmatmul.mubr.msk.f32.gmra.mxu1 %vm271_vm0, %v1625_v35 }
  0xc3   : > { %v1733_v42 = vpop.permute.xlu0 %233  ;;  %v1746_v52 = vpop.permute.xlu1 %243 }
  0xc7   : > { %v1738_v47 = vpop.permute.xlu0 %238  ;;  %v1760_v1 = vpop.permute.xlu1 %248 }
  0xcb   : > { %v1770_v10 = vpop.permute.xlu0 %253  ;;  %v1780_v19 = vpop.permute.xlu1 %258 }
  0xcf   : > { %v1790_v28 = vpop.permute.xlu0 %263  ;;  %v1800_v37 = vpop.permute.xlu1 %268 }
  0xfd   : > { %v362_v43 = vpop.f32.mrf.mxu0  ;;  %v475_v44 = vpop.f32.mrf.mxu1 }
  0xfe   : > { %v363_v45 = vadd.f32 %v362_v43, %v1733_v42  ;;  %v476_v46 = vadd.f32 %v475_v44, %v1733_v42 }
  0xff   : > { %v364_v48 = vpop.f32.mrf.mxu0  ;;  %v477_v49 = vpop.f32.mrf.mxu1 }
 0x100   : > { %974 = vst [vmem:[%s1740_s22] sm:$0xff] %v363_v45  ;;  %976 = vst [vmem:[%s1740_s22 + $0x10] sm:$0xff] %v476_v46  ;;  %v365_v50 = vadd.f32 %v364_v48, %v1733_v42  ;;  %v478_v51 = vadd.f32 %v477_v49, %v1733_v42 }
 0x101   : > { %v368_v53 = vpop.f32.mrf.mxu0  ;;  %v481_v54 = vpop.f32.mrf.mxu1 }
 0x102   : > { %975 = vst [vmem:[%s1740_s22 + $0x8] sm:$0xff] %v365_v50  ;;  %977 = vst [vmem:[%s1740_s22 + $0x18] sm:$0xff] %v478_v51  ;;  %v369_v55 = vadd.f32 %v368_v53, %v1738_v47  ;;  %v482_v56 = vadd.f32 %v481_v54, %v1738_v47 }
 0x103   : > { %v370_v57 = vpop.f32.mrf.mxu0  ;;  %v483_v58 = vpop.f32.mrf.mxu1 }
 0x104   : > { %986 = vst [vmem:[%s1740_s22 + $0x60] sm:$0xff] %v369_v55  ;;  %988 = vst [vmem:[%s1740_s22 + $0x70] sm:$0xff] %v482_v56  ;;  %v371_v59 = vadd.f32 %v370_v57, %v1738_v47  ;;  %v484_v60 = vadd.f32 %v483_v58, %v1738_v47 }
 0x105   : > { %v374_v61 = vpop.f32.mrf.mxu0  ;;  %v487_v62 = vpop.f32.mrf.mxu1 }
 0x106   : > { %987 = vst [vmem:[%s1740_s22 + $0x68] sm:$0xff] %v371_v59  ;;  %989 = vst [vmem:[%s1740_s22 + $0x78] sm:$0xff] %v484_v60  ;;  %v375_v63 = vadd.f32 %v374_v61, %v1746_v52  ;;  %v488_v0 = vadd.f32 %v487_v62, %v1746_v52 }
 0x107   : > { %v376_v2 = vpop.f32.mrf.mxu0  ;;  %v489_v3 = vpop.f32.mrf.mxu1 }
 0x108   : > { %998 = vst [vmem:[%s1740_s22 + $0xc0] sm:$0xff] %v375_v63  ;;  %1000 = vst [vmem:[%s1740_s22 + $0xd0] sm:$0xff] %v488_v0  ;;  %v377_v4 = vadd.f32 %v376_v2, %v1746_v52  ;;  %v490_v5 = vadd.f32 %v489_v3, %v1746_v52 }
 0x109   : > { %v380_v6 = vpop.f32.mrf.mxu0  ;;  %v493_v7 = vpop.f32.mrf.mxu1 }
 0x10a   : > { %999 = vst [vmem:[%s1740_s22 + $0xc8] sm:$0xff] %v377_v4  ;;  %1001 = vst [vmem:[%s1740_s22 + $0xd8] sm:$0xff] %v490_v5  ;;  %v381_v8 = vadd.f32 %v380_v6, %v1760_v1  ;;  %v494_v9 = vadd.f32 %v493_v7, %v1760_v1 }
 0x10b   : > { %v382_v11 = vpop.f32.mrf.mxu0  ;;  %v495_v12 = vpop.f32.mrf.mxu1 }
 0x10c   : > { %1010 = vst [vmem:[%s1740_s22 + $0x120] sm:$0xff] %v381_v8  ;;  %1012 = vst [vmem:[%s1740_s22 + $0x130] sm:$0xff] %v494_v9  ;;  %v383_v13 = vadd.f32 %v382_v11, %v1760_v1  ;;  %v496_v14 = vadd.f32 %v495_v12, %v1760_v1 }
 0x10d   : > { %v386_v15 = vpop.f32.mrf.mxu0  ;;  %v499_v16 = vpop.f32.mrf.mxu1 }
 0x10e   : > { %1011 = vst [vmem:[%s1740_s22 + $0x128] sm:$0xff] %v383_v13  ;;  %1013 = vst [vmem:[%s1740_s22 + $0x138] sm:$0xff] %v496_v14  ;;  %v387_v17 = vadd.f32 %v386_v15, %v1770_v10  ;;  %v500_v18 = vadd.f32 %v499_v16, %v1770_v10 }
 0x10f   : > { %v388_v20 = vpop.f32.mrf.mxu0  ;;  %v501_v21 = vpop.f32.mrf.mxu1 }
 0x110   : > { %1022 = vst [vmem:[%s1740_s22 + $0x180] sm:$0xff] %v387_v17  ;;  %1024 = vst [vmem:[%s1740_s22 + $0x190] sm:$0xff] %v500_v18  ;;  %v389_v22 = vadd.f32 %v388_v20, %v1770_v10  ;;  %v502_v23 = vadd.f32 %v501_v21, %v1770_v10 }
 0x111   : > { %v392_v24 = vpop.f32.mrf.mxu0  ;;  %v505_v25 = vpop.f32.mrf.mxu1 }
 0x112   : > { %1023 = vst [vmem:[%s1740_s22 + $0x188] sm:$0xff] %v389_v22  ;;  %1025 = vst [vmem:[%s1740_s22 + $0x198] sm:$0xff] %v502_v23  ;;  %v393_v26 = vadd.f32 %v392_v24, %v1780_v19  ;;  %v506_v27 = vadd.f32 %v505_v25, %v1780_v19 }
 0x113   : > { %v394_v29 = vpop.f32.mrf.mxu0  ;;  %v507_v30 = vpop.f32.mrf.mxu1 }
 0x114   : > { %1034 = vst [vmem:[%s1740_s22 + $0x1e0] sm:$0xff] %v393_v26  ;;  %1036 = vst [vmem:[%s1740_s22 + $0x1f0] sm:$0xff] %v506_v27  ;;  %v395_v31 = vadd.f32 %v394_v29, %v1780_v19  ;;  %v508_v32 = vadd.f32 %v507_v30, %v1780_v19 }
 0x115   : > { %v398_v33 = vpop.f32.mrf.mxu0  ;;  %v511_v34 = vpop.f32.mrf.mxu1 }
 0x116   : > { %1035 = vst [vmem:[%s1740_s22 + $0x1e8] sm:$0xff] %v395_v31  ;;  %1037 = vst [vmem:[%s1740_s22 + $0x1f8] sm:$0xff] %v508_v32  ;;  %v399_v35 = vadd.f32 %v398_v33, %v1790_v28  ;;  %v512_v36 = vadd.f32 %v511_v34, %v1790_v28 }
 0x117   : > { %v400_v38 = vpop.f32.mrf.mxu0  ;;  %v513_v39 = vpop.f32.mrf.mxu1 }
 0x118   : > { %1046 = vst [vmem:[%s1740_s22 + $0x240] sm:$0xff] %v399_v35  ;;  %1048 = vst [vmem:[%s1740_s22 + $0x250] sm:$0xff] %v512_v36  ;;  %v401_v40 = vadd.f32 %v400_v38, %v1790_v28  ;;  %v514_v41 = vadd.f32 %v513_v39, %v1790_v28 }
 0x119   : > { %v404_v43 = vpop.f32.mrf.mxu0  ;;  %v517_v44 = vpop.f32.mrf.mxu1 }
 0x11a   : > { %1047 = vst [vmem:[%s1740_s22 + $0x248] sm:$0xff] %v401_v40  ;;  %1049 = vst [vmem:[%s1740_s22 + $0x258] sm:$0xff] %v514_v41  ;;  %v405_v45 = vadd.f32 %v404_v43, %v1800_v37  ;;  %v518_v46 = vadd.f32 %v517_v44, %v1800_v37 }
 0x11b   : > { %v406_v48 = vpop.f32.mrf.mxu0  ;;  %v519_v49 = vpop.f32.mrf.mxu1 }
 0x11c   : > { %1058 = vst [vmem:[%s1740_s22 + $0x2a0] sm:$0xff] %v405_v45  ;;  %1060 = vst [vmem:[%s1740_s22 + $0x2b0] sm:$0xff] %v518_v46  ;;  %v407_v50 = vadd.f32 %v406_v48, %v1800_v37  ;;  %v520_v51 = vadd.f32 %v519_v49, %v1800_v37 }
 0x11d   : > { %v588_v53 = vpop.f32.mrf.mxu0  ;;  %v701_v54 = vpop.f32.mrf.mxu1 }
 0x11e   : > { %1059 = vst [vmem:[%s1740_s22 + $0x2a8] sm:$0xff] %v407_v50  ;;  %1061 = vst [vmem:[%s1740_s22 + $0x2b8] sm:$0xff] %v520_v51  ;;  %v589_v55 = vadd.f32 %v588_v53, %v1733_v42  ;;  %v702_v56 = vadd.f32 %v701_v54, %v1733_v42 }
 0x11f   : > { %v590_v57 = vpop.f32.mrf.mxu0  ;;  %v703_v58 = vpop.f32.mrf.mxu1 }
 0x120   : > { %978 = vst [vmem:[%s1740_s22 + $0x20] sm:$0xff] %v589_v55  ;;  %980 = vst [vmem:[%s1740_s22 + $0x30] sm:$0xff] %v702_v56  ;;  %v591_v59 = vadd.f32 %v590_v57, %v1733_v42  ;;  %v704_v60 = vadd.f32 %v703_v58, %v1733_v42 }
 0x121   : > { %v594_v61 = vpop.f32.mrf.mxu0  ;;  %v707_v62 = vpop.f32.mrf.mxu1 }
 0x122   : > { %979 = vst [vmem:[%s1740_s22 + $0x28] sm:$0xff] %v591_v59  ;;  %981 = vst [vmem:[%s1740_s22 + $0x38] sm:$0xff] %v704_v60  ;;  %v595_v63 = vadd.f32 %v594_v61, %v1738_v47  ;;  %v708_v0 = vadd.f32 %v707_v62, %v1738_v47 }
 0x123   : > { %v596_v2 = vpop.f32.mrf.mxu0  ;;  %v709_v3 = vpop.f32.mrf.mxu1 }
 0x124   : > { %990 = vst [vmem:[%s1740_s22 + $0x80] sm:$0xff] %v595_v63  ;;  %992 = vst [vmem:[%s1740_s22 + $0x90] sm:$0xff] %v708_v0  ;;  %v597_v4 = vadd.f32 %v596_v2, %v1738_v47  ;;  %v710_v5 = vadd.f32 %v709_v3, %v1738_v47 }
 0x125   : > { %v600_v6 = vpop.f32.mrf.mxu0  ;;  %v713_v7 = vpop.f32.mrf.mxu1 }
 0x126   : > { %991 = vst [vmem:[%s1740_s22 + $0x88] sm:$0xff] %v597_v4  ;;  %993 = vst [vmem:[%s1740_s22 + $0x98] sm:$0xff] %v710_v5  ;;  %v601_v8 = vadd.f32 %v600_v6, %v1746_v52  ;;  %v714_v9 = vadd.f32 %v713_v7, %v1746_v52 }
 0x127   : > { %v602_v11 = vpop.f32.mrf.mxu0  ;;  %v715_v12 = vpop.f32.mrf.mxu1 }
 0x128   : > { %1002 = vst [vmem:[%s1740_s22 + $0xe0] sm:$0xff] %v601_v8  ;;  %1004 = vst [vmem:[%s1740_s22 + $0xf0] sm:$0xff] %v714_v9  ;;  %v603_v13 = vadd.f32 %v602_v11, %v1746_v52  ;;  %v716_v14 = vadd.f32 %v715_v12, %v1746_v52 }
 0x129   : > { %v606_v15 = vpop.f32.mrf.mxu0  ;;  %v719_v16 = vpop.f32.mrf.mxu1 }
 0x12a   : > { %1003 = vst [vmem:[%s1740_s22 + $0xe8] sm:$0xff] %v603_v13  ;;  %1005 = vst [vmem:[%s1740_s22 + $0xf8] sm:$0xff] %v716_v14  ;;  %v607_v17 = vadd.f32 %v606_v15, %v1760_v1  ;;  %v720_v18 = vadd.f32 %v719_v16, %v1760_v1 }
 0x12b   : > { %v608_v20 = vpop.f32.mrf.mxu0  ;;  %v721_v21 = vpop.f32.mrf.mxu1 }
 0x12c   : > { %1014 = vst [vmem:[%s1740_s22 + $0x140] sm:$0xff] %v607_v17  ;;  %1016 = vst [vmem:[%s1740_s22 + $0x150] sm:$0xff] %v720_v18  ;;  %v609_v22 = vadd.f32 %v608_v20, %v1760_v1  ;;  %v722_v23 = vadd.f32 %v721_v21, %v1760_v1 }
 0x12d   : > { %v612_v24 = vpop.f32.mrf.mxu0  ;;  %v725_v25 = vpop.f32.mrf.mxu1 }
 0x12e   : > { %1015 = vst [vmem:[%s1740_s22 + $0x148] sm:$0xff] %v609_v22  ;;  %1017 = vst [vmem:[%s1740_s22 + $0x158] sm:$0xff] %v722_v23  ;;  %v613_v26 = vadd.f32 %v612_v24, %v1770_v10  ;;  %v726_v27 = vadd.f32 %v725_v25, %v1770_v10 }
 0x12f   : > { %v614_v29 = vpop.f32.mrf.mxu0  ;;  %v727_v30 = vpop.f32.mrf.mxu1 }
 0x130   : > { %1026 = vst [vmem:[%s1740_s22 + $0x1a0] sm:$0xff] %v613_v26  ;;  %1028 = vst [vmem:[%s1740_s22 + $0x1b0] sm:$0xff] %v726_v27  ;;  %v615_v31 = vadd.f32 %v614_v29, %v1770_v10  ;;  %v728_v32 = vadd.f32 %v727_v30, %v1770_v10 }
 0x131   : > { %v618_v33 = vpop.f32.mrf.mxu0  ;;  %v731_v34 = vpop.f32.mrf.mxu1 }
 0x132   : > { %1027 = vst [vmem:[%s1740_s22 + $0x1a8] sm:$0xff] %v615_v31  ;;  %1029 = vst [vmem:[%s1740_s22 + $0x1b8] sm:$0xff] %v728_v32  ;;  %v619_v35 = vadd.f32 %v618_v33, %v1780_v19  ;;  %v732_v36 = vadd.f32 %v731_v34, %v1780_v19 }
 0x133   : > { %v620_v38 = vpop.f32.mrf.mxu0  ;;  %v733_v39 = vpop.f32.mrf.mxu1 }
 0x134   : > { %1038 = vst [vmem:[%s1740_s22 + $0x200] sm:$0xff] %v619_v35  ;;  %1040 = vst [vmem:[%s1740_s22 + $0x210] sm:$0xff] %v732_v36  ;;  %v621_v40 = vadd.f32 %v620_v38, %v1780_v19  ;;  %v734_v41 = vadd.f32 %v733_v39, %v1780_v19 }
 0x135   : > { %v624_v43 = vpop.f32.mrf.mxu0  ;;  %v737_v44 = vpop.f32.mrf.mxu1 }
 0x136   : > { %1039 = vst [vmem:[%s1740_s22 + $0x208] sm:$0xff] %v621_v40  ;;  %1041 = vst [vmem:[%s1740_s22 + $0x218] sm:$0xff] %v734_v41  ;;  %v625_v45 = vadd.f32 %v624_v43, %v1790_v28  ;;  %v738_v46 = vadd.f32 %v737_v44, %v1790_v28 }
 0x137   : > { %v626_v48 = vpop.f32.mrf.mxu0  ;;  %v739_v49 = vpop.f32.mrf.mxu1 }
 0x138   : > { %1050 = vst [vmem:[%s1740_s22 + $0x260] sm:$0xff] %v625_v45  ;;  %1052 = vst [vmem:[%s1740_s22 + $0x270] sm:$0xff] %v738_v46  ;;  %v627_v50 = vadd.f32 %v626_v48, %v1790_v28  ;;  %v740_v51 = vadd.f32 %v739_v49, %v1790_v28 }
 0x139   : > { %v630_v53 = vpop.f32.mrf.mxu0  ;;  %v743_v54 = vpop.f32.mrf.mxu1 }
 0x13a   : > { %1051 = vst [vmem:[%s1740_s22 + $0x268] sm:$0xff] %v627_v50  ;;  %1053 = vst [vmem:[%s1740_s22 + $0x278] sm:$0xff] %v740_v51  ;;  %v631_v55 = vadd.f32 %v630_v53, %v1800_v37  ;;  %v744_v56 = vadd.f32 %v743_v54, %v1800_v37 }
 0x13b   : > { %v632_v57 = vpop.f32.mrf.mxu0  ;;  %v745_v58 = vpop.f32.mrf.mxu1 }
 0x13c   : > { %1062 = vst [vmem:[%s1740_s22 + $0x2c0] sm:$0xff] %v631_v55  ;;  %1064 = vst [vmem:[%s1740_s22 + $0x2d0] sm:$0xff] %v744_v56  ;;  %v633_v59 = vadd.f32 %v632_v57, %v1800_v37  ;;  %v746_v60 = vadd.f32 %v745_v58, %v1800_v37 }
 0x13d   : > { %v814_v61 = vpop.f32.mrf.mxu0  ;;  %v927_v62 = vpop.f32.mrf.mxu1 }
 0x13e   : > { %1063 = vst [vmem:[%s1740_s22 + $0x2c8] sm:$0xff] %v633_v59  ;;  %1065 = vst [vmem:[%s1740_s22 + $0x2d8] sm:$0xff] %v746_v60  ;;  %v815_v63 = vadd.f32 %v814_v61, %v1733_v42  ;;  %v928_v0 = vadd.f32 %v927_v62, %v1733_v42 }
 0x13f   : > { %v816_v2 = vpop.f32.mrf.mxu0  ;;  %v929_v3 = vpop.f32.mrf.mxu1 }
 0x140   : > { %982 = vst [vmem:[%s1740_s22 + $0x40] sm:$0xff] %v815_v63  ;;  %984 = vst [vmem:[%s1740_s22 + $0x50] sm:$0xff] %v928_v0  ;;  %v817_v4 = vadd.f32 %v816_v2, %v1733_v42  ;;  %v930_v5 = vadd.f32 %v929_v3, %v1733_v42 }
 0x141   : > { %v820_v6 = vpop.f32.mrf.mxu0  ;;  %v933_v7 = vpop.f32.mrf.mxu1 }
 0x142   : > { %983 = vst [vmem:[%s1740_s22 + $0x48] sm:$0xff] %v817_v4  ;;  %985 = vst [vmem:[%s1740_s22 + $0x58] sm:$0xff] %v930_v5  ;;  %v821_v8 = vadd.f32 %v820_v6, %v1738_v47  ;;  %v934_v9 = vadd.f32 %v933_v7, %v1738_v47 }
 0x143   : > { %v822_v11 = vpop.f32.mrf.mxu0  ;;  %v935_v12 = vpop.f32.mrf.mxu1 }
 0x144   : > { %994 = vst [vmem:[%s1740_s22 + $0xa0] sm:$0xff] %v821_v8  ;;  %996 = vst [vmem:[%s1740_s22 + $0xb0] sm:$0xff] %v934_v9  ;;  %v823_v13 = vadd.f32 %v822_v11, %v1738_v47  ;;  %v936_v42 = vadd.f32 %v935_v12, %v1738_v47 }
 0x145   : > { %v826_v14 = vpop.f32.mrf.mxu0  ;;  %v939_v15 = vpop.f32.mrf.mxu1 }
 0x146   : > { %995 = vst [vmem:[%s1740_s22 + $0xa8] sm:$0xff] %v823_v13  ;;  %997 = vst [vmem:[%s1740_s22 + $0xb8] sm:$0xff] %v936_v42  ;;  %v827_v16 = vadd.f32 %v826_v14, %v1746_v52  ;;  %v940_v17 = vadd.f32 %v939_v15, %v1746_v52 }
 0x147   : > { %v828_v18 = vpop.f32.mrf.mxu0  ;;  %v941_v20 = vpop.f32.mrf.mxu1 }
 0x148   : > { %1006 = vst [vmem:[%s1740_s22 + $0x100] sm:$0xff] %v827_v16  ;;  %1008 = vst [vmem:[%s1740_s22 + $0x110] sm:$0xff] %v940_v17  ;;  %v829_v21 = vadd.f32 %v828_v18, %v1746_v52  ;;  %v942_v47 = vadd.f32 %v941_v20, %v1746_v52 }
 0x149   : > { %v832_v22 = vpop.f32.mrf.mxu0  ;;  %v945_v23 = vpop.f32.mrf.mxu1 }
 0x14a   : > { %1007 = vst [vmem:[%s1740_s22 + $0x108] sm:$0xff] %v829_v21  ;;  %1009 = vst [vmem:[%s1740_s22 + $0x118] sm:$0xff] %v942_v47  ;;  %v833_v24 = vadd.f32 %v832_v22, %v1760_v1  ;;  %v946_v25 = vadd.f32 %v945_v23, %v1760_v1 }
 0x14b   : > { %v834_v26 = vpop.f32.mrf.mxu0  ;;  %v947_v27 = vpop.f32.mrf.mxu1 }
 0x14c   : > { %1018 = vst [vmem:[%s1740_s22 + $0x160] sm:$0xff] %v833_v24  ;;  %1020 = vst [vmem:[%s1740_s22 + $0x170] sm:$0xff] %v946_v25  ;;  %v835_v29 = vadd.f32 %v834_v26, %v1760_v1  ;;  %v948_v52 = vadd.f32 %v947_v27, %v1760_v1 }
 0x14d   : > { %v838_v30 = vpop.f32.mrf.mxu0  ;;  %v951_v31 = vpop.f32.mrf.mxu1 }
 0x14e   : > { %1019 = vst [vmem:[%s1740_s22 + $0x168] sm:$0xff] %v835_v29  ;;  %1021 = vst [vmem:[%s1740_s22 + $0x178] sm:$0xff] %v948_v52  ;;  %v839_v32 = vadd.f32 %v838_v30, %v1770_v10  ;;  %v952_v33 = vadd.f32 %v951_v31, %v1770_v10 }
 0x14f   : > { %v840_v34 = vpop.f32.mrf.mxu0  ;;  %v953_v35 = vpop.f32.mrf.mxu1 }
 0x150   : > { %1030 = vst [vmem:[%s1740_s22 + $0x1c0] sm:$0xff] %v839_v32  ;;  %1032 = vst [vmem:[%s1740_s22 + $0x1d0] sm:$0xff] %v952_v33  ;;  %v841_v36 = vadd.f32 %v840_v34, %v1770_v10  ;;  %v954_v1 = vadd.f32 %v953_v35, %v1770_v10 }
 0x151   : > { %v844_v38 = vpop.f32.mrf.mxu0  ;;  %v957_v39 = vpop.f32.mrf.mxu1 }
 0x152   : > { %1031 = vst [vmem:[%s1740_s22 + $0x1c8] sm:$0xff] %v841_v36  ;;  %1033 = vst [vmem:[%s1740_s22 + $0x1d8] sm:$0xff] %v954_v1  ;;  %v845_v40 = vadd.f32 %v844_v38, %v1780_v19  ;;  %v958_v41 = vadd.f32 %v957_v39, %v1780_v19 }
 0x153   : > { %v846_v43 = vpop.f32.mrf.mxu0  ;;  %v959_v44 = vpop.f32.mrf.mxu1 }
 0x154   : > { %1042 = vst [vmem:[%s1740_s22 + $0x220] sm:$0xff] %v845_v40  ;;  %1044 = vst [vmem:[%s1740_s22 + $0x230] sm:$0xff] %v958_v41  ;;  %v847_v45 = vadd.f32 %v846_v43, %v1780_v19  ;;  %v960_v10 = vadd.f32 %v959_v44, %v1780_v19 }
 0x155   : > { %v850_v46 = vpop.f32.mrf.mxu0  ;;  %v963_v48 = vpop.f32.mrf.mxu1 }
 0x156   : > { %1043 = vst [vmem:[%s1740_s22 + $0x228] sm:$0xff] %v847_v45  ;;  %1045 = vst [vmem:[%s1740_s22 + $0x238] sm:$0xff] %v960_v10  ;;  %v851_v49 = vadd.f32 %v850_v46, %v1790_v28  ;;  %v964_v50 = vadd.f32 %v963_v48, %v1790_v28 }
 0x157   : > { %v852_v51 = vpop.f32.mrf.mxu0  ;;  %v965_v53 = vpop.f32.mrf.mxu1 }
 0x158   : > { %1054 = vst [vmem:[%s1740_s22 + $0x280] sm:$0xff] %v851_v49  ;;  %1056 = vst [vmem:[%s1740_s22 + $0x290] sm:$0xff] %v964_v50  ;;  %v853_v54 = vadd.f32 %v852_v51, %v1790_v28  ;;  %v966_v19 = vadd.f32 %v965_v53, %v1790_v28 }
 0x159   : > { %v856_v55 = vpop.f32.mrf.mxu0  ;;  %v969_v56 = vpop.f32.mrf.mxu1 }
 0x15a   : > { %1055 = vst [vmem:[%s1740_s22 + $0x288] sm:$0xff] %v853_v54  ;;  %1057 = vst [vmem:[%s1740_s22 + $0x298] sm:$0xff] %v966_v19  ;;  %v857_v57 = vadd.f32 %v856_v55, %v1800_v37  ;;  %v970_v58 = vadd.f32 %v969_v56, %v1800_v37 }
 0x15b   : > { %v858_v59 = vpop.f32.mrf.mxu0  ;;  %v971_v28 = vpop.f32.mrf.mxu1 }
 0x15c   : > { %1066 = vst [vmem:[%s1740_s22 + $0x2e0] sm:$0xff] %v857_v57  ;;  %1068 = vst [vmem:[%s1740_s22 + $0x2f0] sm:$0xff] %v970_v58  ;;  %v859_v60 = vadd.f32 %v858_v59, %v1800_v37  ;;  %v972_v61 = vadd.f32 %v971_v28, %v1800_v37 }
 0x15e   : > { %1067 = vst [vmem:[%s1740_s22 + $0x2e8] sm:$0xff] %v859_v60  ;;  %1069 = vst [vmem:[%s1740_s22 + $0x2f8] sm:$0xff] %v972_v61 }
 0x15f   : > { %1315 = shalt.err (!%p1312_p10)
}
 0x160   : > { %s1316_s27 = scalar_lea.hbm %s1943_s7, 12288  ;;  %s1320_s5 = scalar_lea.hbm %s1997_s3, 24576 }
 0x161   : > { %p1317_p1 = scmp.ne.s32.totalorder %s1943_s7, %s1316_s27  ;;  %p1321_p0 = scmp.lt.s32.totalorder %s1943_s7, %s1997_s3 }
 0x162   : > { %p1322_p2 = scmp.lt.s32.totalorder %s1320_s5, %s1316_s27 }
 0x163   : > { %p1318_p3 = pnand %p1317_p1, %p2006_p12 }
 0x164   : > { %p1323_p6 = por %p1322_p2, %p1321_p0 }
 0x165   : > { %p1319_p9 = pneg %p1318_p3 }
 0x167   : > { %p1324_p11 = pnand %p1323_p6, %p1319_p9 }
 0x169   : > { %1327 = shalt.err (!%p1324_p11)
}
 0x16a   : > { %s1375_s11 = smov 1536   ;;  %s1376_s22 = smov 3072  }
 0x16b   : > { %s1377_s30 = smov 96  }
 0x16c   : > { %1220 = dma.vmem_to_hbm [thread:$0]  (%p2006_p12), %s1945_s4, 12288, %s1943_s7, %s1071_s17, %s1375_s11, %s1376_s22, %s1377_s30  }
 0x16d PF: > { %s1099_s16 = sand.u32 1, %s1354_s12   ;;  %p2007_p13 = scmp.ne.s32.totalorder %s2002_s24, 0 }
 0x16e   : > { %p2008_p4 = scmp.ge.s32.totalorder %s1366_s15, 2  ;;  %s1100_s6 = scalar_lea.sflag [#allocation4], %s1099_s16 }
 0x170   : > { %p1227_p5 = pnand %p2008_p4, %p2007_p13 }
 0x172   : > { %p1228_p7 = pneg %p1227_p5 }
 0x174   : > { %1349 = dma.done.wait (%p1228_p7), %s1100_s6, 12288  }
 0x175   : > { %1351 = vsyncadd (%p1228_p7), %s1100_s6, 4294955008  ;;  %p16_p8 = scmp.ge.s32.totalorder %s1423_s18, 4   ;;  %s2009_s12 = smov %s1358_s13 }
 0x176   : > { %s2010_s13 = smov %s1362_s14  ;;  %s2011_s14 = smov %s1435_s21 }
 0x177   : > { %s2012_s15 = smov %s1423_s18  ;;  %18 = sbr.rel (!%p16_p8) target bundleno = 5 (0x5), region = 77 }
 0x17c   :  { %1105 = vsyncpa [#allocation3], 1 }
 0x17d   :  { %1107 = vsyncpa [#allocation3 + $0x1], 1 }
 0x17e   :  { %1108 = vsyncpa [#allocation4], 1 }
 0x17f   :  { %1110 = vsyncpa [#allocation4 + $0x1], 1 }

</bundles_post_ra>
